<compile_context>
chip_gen: v7x
topology: tpu7x:2x2x1
jax: 0.10.0
libtpu: 0.0.40
codegen_flags: <defaults>
</compile_context>

<pallas_src>
import jax
import jax.numpy as jnp
from jax import lax
from jax.experimental import pallas as pl
from jax.experimental.pallas import tpu as pltpu


def _round_up(x, m):
    return ((x + m - 1) // m) * m


# --------------------------------------------------------------------------
# Kernel: one grid step gathers `tile` rows via one-hot compare + MXU matmul.
# --------------------------------------------------------------------------
def _gather_tile_kernel(idx_ref, table_ref, out_ref):
    """idx_ref  : VMEM (1, tile)   int32  -- this tile's indices (lane-dense)
       table_ref: VMEM (8, Kp)     f32    -- fused transposed table (resident)
       out_ref  : VMEM (8, tile)   f32    -- lane-dense fused output tile
    """
    kp = table_ref.shape[1]
    tile = out_ref.shape[1]
    # one-hot[k, t] = (k == idx[t]); iota along the sublane axis, idx broadcast.
    row_ids = lax.broadcasted_iota(jnp.int32, (kp, tile), 0)
    onehot = (row_ids == idx_ref[...]).astype(jnp.float32)          # (Kp, tile)
    # (8, Kp) @ (Kp, tile) -> (8, tile) on the MXU (otherwise idle here).
    out_ref[...] = jnp.dot(table_ref[...], onehot,
                           preferred_element_type=jnp.float32)


# --------------------------------------------------------------------------
# Table build -- hoist this: it only changes when parameters change.
# --------------------------------------------------------------------------
def build_encoder_table(scales, trans):
    """Fuse scales/trans into a lane-dense transposed table (8, Kp) f32.

    rows 0-2 = scales^T, rows 3-5 = trans^T, rows 6-7 = zero pad.
    Columns are zero-padded so Kp is a multiple of 128 (lane width).
    """
    scales = jnp.asarray(scales, jnp.float32)
    trans = jnp.asarray(trans, jnp.float32)
    num_data, feat = scales.shape                      # feat == 3
    kp = _round_up(max(num_data, 1), 128)
    fused_t = jnp.concatenate([scales, trans], axis=1).T          # (6, num_data)
    table = jnp.pad(fused_t, ((0, 8 - 2 * feat), (0, kp - num_data)))
    return table                                                   # (8, kp)


# --------------------------------------------------------------------------
# Pallas gather on a prebuilt table.
# --------------------------------------------------------------------------
def encoder_apply(idx, table, num_data, *, block_rows=2048, feat=3,
                  xla_fallback_below=0):
    idx = jnp.asarray(idx, jnp.int32)
    b = idx.shape[0]
    kp = table.shape[1]

    # Clamp: in-kernel VMEM reads are not bounds-checked, and padded table
    # columns (>= num_data) must never be selected.
    idx = jnp.clip(idx, 0, num_data - 1)

    if b < xla_fallback_below:
        # Plain XLA gather wins for small batches (launch + step overhead).
        scale = table[0:feat, :].T[idx]
        trans_out = table[feat:2 * feat, :].T[idx]
        return {"scale": scale, "trans": trans_out}

    # Tile size: multiple of 128 (lane-dense output), capped so the in-kernel
    # one-hot (Kp x tile f32) stays under ~4 MiB of VMEM, and no bigger than
    # the (128-rounded) batch itself.
    block_rows = _round_up(max(int(block_rows), 128), 128)
    onehot_cap = max(128, ((4 << 20) // (kp * 4)) // 128 * 128)
    tile = min(block_rows, onehot_cap, _round_up(b, 128))
    b_pad = _round_up(b, tile)
    num_tiles = b_pad // tile

    # Padded index entries are 0 (valid row); their outputs are sliced off.
    idx_p = jnp.pad(idx, (0, b_pad - b)).reshape(1, b_pad)

    gathered = pl.pallas_call(
        _gather_tile_kernel,
        out_shape=jax.ShapeDtypeStruct((8, b_pad), jnp.float32),
        grid_spec=pltpu.PrefetchScalarGridSpec(
            num_scalar_prefetch=0,
            grid=(num_tiles,),
            in_specs=[
                pl.BlockSpec((1, tile), lambda i: (0, i)),      # idx (lane-dense)
                pl.BlockSpec((8, kp), lambda i: (0, 0)),        # table, resident
            ],
            out_specs=pl.BlockSpec((8, tile), lambda i: (0, i)),  # lane-dense out
        ),
        compiler_params=pltpu.CompilerParams(
            dimension_semantics=("parallel",),   # independent tiles; v7x 2-TC
        ),
    )(idx_p, table)

    gathered = gathered[:, :b]                   # (8, b)
    return {
        "scale": gathered[0:feat, :].T,          # (b, 3)
        "trans": gathered[feat:2 * feat, :].T,   # (b, 3)
    }


# Convenience wrapper matching the old signature (builds the table per call;
# prefer build_encoder_table() once + encoder_apply() in hot loops).
def encoder_forward(idx, scales, trans, *, block_rows=2048, xla_fallback_below=0):
    table = build_encoder_table(scales, trans)
    return encoder_apply(idx, table, scales.shape[0],
                         block_rows=block_rows, feat=scales.shape[1],
                         xla_fallback_below=xla_fallback_below)


def init_encoder_params(key, num_data, trans_init=None):
    """Deterministic re-implementation of Encoder.reset_parameters()."""
    scales = jnp.ones((num_data, 3), dtype=jnp.float32)      # constant 1.0, frozen
    if trans_init is not None:
        trans = jnp.full((num_data, 3), float(trans_init), dtype=jnp.float32)
    else:
        trans = 5.0 * jax.random.normal(key, (num_data, 3), dtype=jnp.float32)
    return scales, trans


if __name__ == "__main__":
    key = jax.random.PRNGKey(0)
    k_trans, k_idx1, k_idx2 = jax.random.split(key, 3)

    num_data = 64
    scales, trans = init_encoder_params(k_trans, num_data, trans_init=None)

    # Build the fused table once (hoisted out of the forward pass).
    table = build_encoder_table(scales, trans)

    # Case 1: single tile (B=300 -> tile 384, grid=(1,)).
    idx1 = jax.random.randint(k_idx1, (300,), 0, num_data, dtype=jnp.int32)
    out1 = encoder_apply(idx1, table, num_data)
    jax.block_until_ready(out1)
    assert out1["scale"].shape == (300, 3) and out1["trans"].shape == (300, 3)
    assert jnp.allclose(out1["scale"], scales[idx1])
    assert jnp.allclose(out1["trans"], trans[idx1])

    # Case 2: multiple grid tiles (B=1200, tile 128 -> 10 tiles).
    idx2 = jax.random.randint(k_idx2, (1200,), 0, num_data, dtype=jnp.int32)
    out2 = encoder_forward(idx2, scales, trans, block_rows=128)
    jax.block_until_ready(out2)
    assert out2["scale"].shape == (1200, 3) and out2["trans"].shape == (1200, 3)
    assert jnp.allclose(out2["scale"], scales[idx2])
    assert jnp.allclose(out2["trans"], trans[idx2])

    print("KERNEL_OK")
</pallas_src>

<mosaic_0001>
module attributes {stable_mosaic.version = 11 : i64} {
  func.func @_gather_tile_kernel(%arg0: i32, %arg1: memref<1x384xi32, #tpu.memory_space<vmem>>, %arg2: memref<8x128xf32, #tpu.memory_space<vmem>>, %arg3: memref<8x384xf32, #tpu.memory_space<vmem>>) attributes {dimension_semantics = [#tpu.dimension_semantics<parallel>], iteration_bounds = array<i64: 1>, scalar_prefetch = 0 : i64, scratch_operands = 0 : i64, tpu.core_type = #tpu.core_type<tc>, window_params = [{transform_indices = @transform_0, window_bounds = array<i64: 1, 384>}, {pipeline_mode = #tpu.pipeline_mode<synchronous>, transform_indices = @transform_1, window_bounds = array<i64: 8, 128>}, {transform_indices = @transform_2, window_bounds = array<i64: 8, 384>}]} {
    %0 = tpu.iota {dimensions = array<i32: 0>} : vector<128x384xi32>
    %c0 = arith.constant 0 : index
    %c0_0 = arith.constant 0 : index
    %1 = vector.load %arg1[%c0, %c0_0] : memref<1x384xi32, #tpu.memory_space<vmem>>, vector<1x384xi32>
    %2 = vector.broadcast %1 : vector<1x384xi32> to vector<128x384xi32>
    %3 = arith.cmpi eq, %0, %2 : vector<128x384xi32>
    %4 = arith.extui %3 : vector<128x384xi1> to vector<128x384xi32>
    %5 = arith.sitofp %4 : vector<128x384xi32> to vector<128x384xf32>
    %c0_1 = arith.constant 0 : index
    %c0_2 = arith.constant 0 : index
    %6 = vector.load %arg2[%c0_1, %c0_2] : memref<8x128xf32, #tpu.memory_space<vmem>>, vector<8x128xf32>
    %cst = arith.constant dense<0.000000e+00> : vector<8x384xf32>
    %7 = tpu.matmul %6, %5, %cst {dimension_numbers = #tpu.dot_dimension_numbers<[1], [0], [0], [1], [0, 0, 1, 1], [], []>} : vector<8x128xf32>, vector<128x384xf32>, vector<8x384xf32> -> vector<8x384xf32>
    %c0_3 = arith.constant 0 : index
    %c0_4 = arith.constant 0 : index
    %8 = vector.load %arg3[%c0_3, %c0_4] : memref<8x384xf32, #tpu.memory_space<vmem>>, vector<8x384xf32>
    tpu.vector_store %arg3[%c0_3, %c0_4], %7 {strides = array<i32>} : memref<8x384xf32, #tpu.memory_space<vmem>>, vector<8x384xf32>,
    return
  }
  func.func @transform_0(%arg0: i32) -> (i32, i32) {
    %c0_i32 = arith.constant 0 : i32
    %c0_i32_0 = arith.constant 0 : i32
    return %c0_i32, %arg0 : i32, i32
  }
  func.func @transform_1(%arg0: i32) -> (i32, i32) {
    %c0_i32 = arith.constant 0 : i32
    %c0_i32_0 = arith.constant 0 : i32
    %c0_i32_1 = arith.constant 0 : i32
    return %c0_i32, %c0_i32_0 : i32, i32
  }
  func.func @transform_2(%arg0: i32) -> (i32, i32) {
    %c0_i32 = arith.constant 0 : i32
    %c0_i32_0 = arith.constant 0 : i32
    return %c0_i32, %arg0 : i32, i32
  }
}

</mosaic_0001>

<bundles_post_ra>
// kernel: tpu_custom_call.1
= control target key start
LH: loop header
LB: loop body
LE: loop exit
PB: predicated region body
PF: predicated region fallthrough
CT: control target
= control target key end

     0   :  { %7 = vsyncpa [#allocation3], 0  ;;  %s821_s0 = inlined_call_operand.hbm [shape: s32[1,384], index: 0, kind: input, shape index: {}]   ;;  %s822_s1 = inlined_call_operand.hbm [shape: f32[8,128], index: 1, kind: input, shape index: {}]   ;;  %s823_s2 = inlined_call_operand.hbm [shape: f32[8,384], index: 2, kind: output, shape index: {}]  }
   0x1   :  { %8 = vsyncpa [#allocation6], 0 }
   0x2   :  { %9 = vsyncpa [#allocation4], 0  ;;  %s654_s9 = smov [#allocation2]   ;;  %s655_s11 = smov [#allocation5]  }
   0x3   :  { %s16_s10 = sshll.u32 %s654_s9, 4  ;;  %s26_s12 = sshll.u32 %s655_s11, 4  ;;  %s17_s10 = int_to_ptr.vmem [resolvable:$true] %s16_s10  ;;  %s27_s12 = int_to_ptr.vmem [resolvable:$true] %s26_s12 }
   0x4   :  { %s582_s15 = scalar_lea.hbm %s821_s0, 48 }
   0x5   :  { %p583_p0 = scmp.ne.s32.totalorder %s821_s0, %s582_s15  ;;  %p586_p1 = scmp.lt.u32.totalorder %s582_s15, %s821_s0 }
   0x7   :  { %p588_p2 = pnand %p586_p1, %p583_p0 }
   0x9   :  { %591 = shalt.err (!%p588_p2)
}
   0xa   :  { %s592_s20 = scalar_lea.vmem %s17_s10, 48  ;;  %s596_s21 = scalar_lea.vmem %s17_s10, 64 }
   0xb   :  { %p593_p3 = scmp.ne.s32.totalorder %s17_s10, %s592_s20  ;;  %p597_p4 = scmp.lt.s32.totalorder %s17_s10, %s17_s10 }
   0xc   :  { %p598_p5 = scmp.lt.s32.totalorder %s596_s21, %s592_s20 }
   0xe   :  { %p599_p6 = por %p598_p5, %p597_p4 }
  0x10   :  { %p600_p7 = pnand %p599_p6, %p593_p3 }
  0x12   :  { %603 = shalt.err (!%p600_p7)
}
  0x13   :  { %19 = dma.hbm_to_vmem [thread:$0]  %s821_s0, 48, %s17_s10, [#allocation3]  }
  0x14   :  { %s604_s26 = scalar_lea.hbm %s822_s1, 128 }
  0x15   :  { %p605_p8 = scmp.ne.s32.totalorder %s822_s1, %s604_s26  ;;  %p608_p9 = scmp.lt.u32.totalorder %s604_s26, %s822_s1 }
  0x17   :  { %p610_p10 = pnand %p608_p9, %p605_p8 }
  0x19   :  { %613 = shalt.err (!%p610_p10)
}
  0x1a   :  { %s614_s3 = scalar_lea.vmem %s27_s12, 128  ;;  %p619_p12 = scmp.lt.s32.totalorder %s27_s12, %s27_s12 }
  0x1b   :  { %p615_p11 = scmp.ne.s32.totalorder %s27_s12, %s614_s3  ;;  %p620_p13 = scmp.lt.s32.totalorder %s614_s3, %s614_s3 }
  0x1d   :  { %p621_p0 = por %p620_p13, %p619_p12 }
  0x1f   :  { %p622_p1 = pnand %p621_p0, %p615_p11 }
  0x21   :  { %625 = shalt.err (!%p622_p1)
}
  0x22   :  { %29 = dma.hbm_to_vmem [thread:$0]  %s822_s1, 128, %s27_s12, [#allocation6]  }
  0x23   :  { %648 = dma.done.wait [#allocation3], 48  }
  0x24   :  { %649 = vsyncadd [#allocation3], 4294967248 }
  0x25   :  { %650 = dma.done.wait [#allocation6], 128  }
  0x26   :  { %651 = vsyncadd [#allocation6], 4294967168  ;;  %v36_v0 = vlaneseq  ;;  %v656_v1 = vmov 0.0|0.0   ;;  %v657_v2 = vmov 0.0   ;;  %vm658_vm0 = vmmov 0   ;;  %v210_v27 = vld [vmem:[#allocation5] sm:$0xff] }
  0x27   :  { %551 = vmatprep.subr.bf16.mxu1 %v656_v1  ;;  %275 = vmatprep.mubr.f32.mxu0 %v657_v2  ;;  %v53_v8 = vld [vmem:[#allocation2] sm:$0x7]  ;;  %v659_v16 = vmov 1.0|1.0   ;;  %s660_s1 = smov [#allocation7]  }
  0x28   :  { %v701_v3 = vshrl.u32 %v36_v0, 7  ;;  %516 = vmatprep.mubr.msk.f32.mxu1 %vm658_vm0, %v657_v2  ;;  %s361_s5 = sshll.u32 %s660_s1, 4  ;;  %s362_s5 = int_to_ptr.vmem [resolvable:$true] %s361_s5 }
  0x29   :  { %s626_s6 = scalar_lea.vmem %s362_s5, 384  ;;  %p631_p3 = scmp.lt.s32.totalorder %s362_s5, %s362_s5 }
  0x2a   :  { %v56_v4 = vsub.s32 0, %v701_v3  ;;  %v60_v5 = vsub.s32 1, %v701_v3  ;;  %v64_v6 = vsub.s32 2, %v701_v3  ;;  %v38_v7 = vadd.s32 8, %v701_v3  ;;  %p627_p2 = scmp.ne.s32.totalorder %s362_s5, %s626_s6  ;;  %p632_p4 = scmp.lt.s32.totalorder %s626_s6, %s626_s6 }
  0x2b   :  { %v39_v9 = vadd.s32 16, %v701_v3  ;;  %v40_v10 = vadd.s32 24, %v701_v3  ;;  %v41_v14 = vadd.s32 32, %v701_v3  ;;  %v42_v15 = vadd.s32 40, %v701_v3 }
  0x2c   :  { %v709_v11 = vrot.slane %v53_v8, %v56_v4  ;;  %v711_v12 = vrot.slane %v53_v8, %v60_v5  ;;  %v713_v13 = vrot.slane %v53_v8, %v64_v6  ;;  %v43_v17 = vadd.s32 48, %v701_v3  ;;  %p633_p5 = por %p632_p4, %p631_p3 }
  0x2d   :  { %v44_v18 = vadd.s32 56, %v701_v3  ;;  %v45_v19 = vadd.s32 64, %v701_v3  ;;  %v46_v20 = vadd.s32 72, %v701_v3  ;;  %v47_v21 = vadd.s32 80, %v701_v3 }
  0x2e   :  { %vm67_vm1 = vcmp.eq.s32.totalorder %v701_v3, %v711_v12  ;;  %vm70_vm2 = vcmp.eq.s32.totalorder %v38_v7, %v711_v12  ;;  %vm66_vm3 = vcmp.eq.s32.totalorder %v701_v3, %v709_v11  ;;  %vm69_vm4 = vcmp.eq.s32.totalorder %v38_v7, %v709_v11  ;;  %p634_p6 = pnand %p633_p5, %p627_p2 }
  0x2f   :  { %vm519_vm5 = vmpackc.low %vm70_vm2, %vm67_vm1  ;;  %vm68_vm6 = vcmp.eq.s32.totalorder %v701_v3, %v713_v13  ;;  %vm71_vm7 = vcmp.eq.s32.totalorder %v38_v7, %v713_v13  ;;  %vm73_vm8 = vcmp.eq.s32.totalorder %v39_v9, %v711_v12  ;;  %vm76_vm9 = vcmp.eq.s32.totalorder %v40_v10, %v711_v12 }
  0x30   :  { %520 = vmatprep.subr.msk.bf16.mxu0 %vm519_vm5, %v659_v16  ;;  %vm521_vm10 = vmpackc.low %vm69_vm4, %vm66_vm3  ;;  %vm72_vm11 = vcmp.eq.s32.totalorder %v39_v9, %v709_v11  ;;  %vm75_vm12 = vcmp.eq.s32.totalorder %v40_v10, %v709_v11  ;;  %vm74_vm14 = vcmp.eq.s32.totalorder %v39_v9, %v713_v13  ;;  %vm77_vm15 = vcmp.eq.s32.totalorder %v40_v10, %v713_v13 }
  0x31   :  { %522 = vmatpush1.bf16.msk.msra.mxu0 %vm521_vm10, %v659_v16  ;;  %vm552_vm13 = vmpackc.low %vm71_vm7, %vm68_vm6  ;;  %vm79_vm1 = vcmp.eq.s32.totalorder %v41_v14, %v711_v12  ;;  %vm82_vm2 = vcmp.eq.s32.totalorder %v42_v15, %v711_v12  ;;  %vm78_vm4 = vcmp.eq.s32.totalorder %v41_v14, %v709_v11  ;;  %vm81_vm5 = vcmp.eq.s32.totalorder %v42_v15, %v709_v11 }
  0x32   :  { %553 = vmatpush3.bf16.msk.msra.mxu1 %vm552_vm13, %v659_v16  ;;  %vm523_vm0 = vmpackc.low %vm76_vm9, %vm73_vm8  ;;  %vm80_vm7 = vcmp.eq.s32.totalorder %v41_v14, %v713_v13  ;;  %vm83_vm10 = vcmp.eq.s32.totalorder %v42_v15, %v713_v13  ;;  %vm85_vm9 = vcmp.eq.s32.totalorder %v43_v17, %v711_v12  ;;  %vm84_vm13 = vcmp.eq.s32.totalorder %v43_v17, %v709_v11 }
  0x33   :  { %524 = vmatprep.subr.msk.bf16.mxu0 %vm523_vm0, %v659_v16  ;;  %554 = vmatprep.subr.bf16.mxu1 %v656_v1  ;;  %vm525_vm3 = vmpackc.low %vm75_vm12, %vm72_vm11  ;;  %vm88_vm11 = vcmp.eq.s32.totalorder %v44_v18, %v711_v12  ;;  %vm86_vm0 = vcmp.eq.s32.totalorder %v43_v17, %v713_v13  ;;  %v48_v22 = vadd.s32 88, %v701_v3  ;;  %v49_v23 = vadd.s32 96, %v701_v3 }
  0x34   :  { %vm555_vm6 = vmpackc.low %vm77_vm15, %vm74_vm14  ;;  %vm87_vm14 = vcmp.eq.s32.totalorder %v44_v18, %v709_v11  ;;  %v50_v24 = vadd.s32 104, %v701_v3  ;;  %v51_v25 = vadd.s32 112, %v701_v3  ;;  %v52_v26 = vadd.s32 120, %v701_v3 }
  0x35   :  { %526 = vmatpush1.bf16.msk.msra.mxu0 %vm525_vm3, %v659_v16  ;;  %vm527_vm8 = vmpackc.low %vm82_vm2, %vm79_vm1  ;;  %vm89_vm1 = vcmp.eq.s32.totalorder %v44_v18, %v713_v13  ;;  %vm91_vm3 = vcmp.eq.s32.totalorder %v45_v19, %v711_v12 }
  0x36   :  { %556 = vmatpush3.bf16.msk.msra.mxu1 %vm555_vm6, %v659_v16  ;;  %528 = vmatprep.subr.msk.bf16.mxu0 %vm527_vm8, %v659_v16  ;;  %vm529_vm12 = vmpackc.low %vm81_vm5, %vm78_vm4  ;;  %vm94_vm6 = vcmp.eq.s32.totalorder %v46_v20, %v711_v12 }
  0x37   :  { %557 = vmatprep.subr.bf16.mxu1 %v656_v1  ;;  %vm558_vm15 = vmpackc.low %vm83_vm10, %vm80_vm7  ;;  %vm90_vm7 = vcmp.eq.s32.totalorder %v45_v19, %v709_v11  ;;  %vm93_vm10 = vcmp.eq.s32.totalorder %v46_v20, %v709_v11 }
  0x38   :  { %vm531_vm2 = vmpackc.low %vm88_vm11, %vm85_vm9  ;;  %vm92_vm9 = vcmp.eq.s32.totalorder %v45_v19, %v713_v13  ;;  %vm95_vm11 = vcmp.eq.s32.totalorder %v46_v20, %v713_v13 }
  0x39   :  { %530 = vmatpush1.bf16.msk.msra.mxu0 %vm529_vm12, %v659_v16  ;;  %vm533_vm4 = vmpackc.low %vm87_vm14, %vm84_vm13  ;;  %vm97_vm12 = vcmp.eq.s32.totalorder %v47_v21, %v711_v12  ;;  %vm100_vm13 = vcmp.eq.s32.totalorder %v48_v22, %v711_v12 }
  0x3a   :  { %559 = vmatpush3.bf16.msk.msra.mxu1 %vm558_vm15, %v659_v16  ;;  %532 = vmatprep.subr.msk.bf16.mxu0 %vm531_vm2, %v659_v16  ;;  %vm561_vm5 = vmpackc.low %vm89_vm1, %vm86_vm0  ;;  %vm96_vm0 = vcmp.eq.s32.totalorder %v47_v21, %v709_v11  ;;  %vm99_vm1 = vcmp.eq.s32.totalorder %v48_v22, %v709_v11 }
  0x3b   :  { %560 = vmatprep.subr.bf16.mxu1 %v656_v1  ;;  %vm535_vm8 = vmpackc.low %vm94_vm6, %vm91_vm3  ;;  %vm98_vm3 = vcmp.eq.s32.totalorder %v47_v21, %v713_v13  ;;  %vm101_vm6 = vcmp.eq.s32.totalorder %v48_v22, %v713_v13 }
  0x3c   :  { %vm537_vm14 = vmpackc.low %vm93_vm10, %vm90_vm7  ;;  %vm106_vm7 = vcmp.eq.s32.totalorder %v50_v24, %v711_v12 }
  0x3d   :  { %534 = vmatpush1.bf16.msk.msra.mxu0 %vm533_vm4, %v659_v16  ;;  %vm564_vm15 = vmpackc.low %vm95_vm11, %vm92_vm9  ;;  %vm103_vm4 = vcmp.eq.s32.totalorder %v49_v23, %v711_v12  ;;  %vm105_vm9 = vcmp.eq.s32.totalorder %v50_v24, %v709_v11 }
  0x3e   :  { %562 = vmatpush3.bf16.msk.msra.mxu1 %vm561_vm5, %v659_v16  ;;  %536 = vmatprep.subr.msk.bf16.mxu0 %vm535_vm8, %v659_v16  ;;  %vm539_vm2 = vmpackc.low %vm100_vm13, %vm97_vm12  ;;  %vm102_vm8 = vcmp.eq.s32.totalorder %v49_v23, %v709_v11  ;;  %vm104_vm12 = vcmp.eq.s32.totalorder %v49_v23, %v713_v13  ;;  %vm107_vm13 = vcmp.eq.s32.totalorder %v50_v24, %v713_v13 }
  0x3f   :  { %563 = vmatprep.subr.bf16.mxu1 %v656_v1  ;;  %vm541_vm5 = vmpackc.low %vm99_vm1, %vm96_vm0  ;;  %vm112_vm0 = vcmp.eq.s32.totalorder %v52_v26, %v711_v12 }
  0x40   :  { %vm567_vm10 = vmpackc.low %vm101_vm6, %vm98_vm3  ;;  %vm108_vm3 = vcmp.eq.s32.totalorder %v51_v25, %v709_v11  ;;  %vm111_vm6 = vcmp.eq.s32.totalorder %v52_v26, %v709_v11 }
  0x41   :  { %538 = vmatpush1.bf16.msk.msra.mxu0 %vm537_vm14, %v659_v16  ;;  %vm543_vm11 = vmpackc.low %vm106_vm7, %vm103_vm4  ;;  %vm109_vm14 = vcmp.eq.s32.totalorder %v51_v25, %v711_v12  ;;  %vm110_vm4 = vcmp.eq.s32.totalorder %v51_v25, %v713_v13  ;;  %vm113_vm7 = vcmp.eq.s32.totalorder %v52_v26, %v713_v13 }
  0x42   :  { %565 = vmatpush3.bf16.msk.msra.mxu1 %vm564_vm15, %v659_v16  ;;  %540 = vmatprep.subr.msk.bf16.mxu0 %vm539_vm2, %v659_v16  ;;  %vm545_vm15 = vmpackc.low %vm105_vm9, %vm102_vm8 }
  0x43   :  { %566 = vmatprep.subr.bf16.mxu1 %v656_v1  ;;  %vm570_vm1 = vmpackc.low %vm107_vm13, %vm104_vm12 }
  0x44   :  { %vm547_vm2 = vmpackc.low %vm112_vm0, %vm109_vm14 }
  0x45   :  { %542 = vmatpush1.bf16.msk.msra.mxu0 %vm541_vm5, %v659_v16  ;;  %vm549_vm5 = vmpackc.low %vm111_vm6, %vm108_vm3 }
  0x46   :  { %568 = vmatpush3.bf16.msk.msra.mxu1 %vm567_vm10, %v659_v16  ;;  %544 = vmatprep.subr.msk.bf16.mxu0 %vm543_vm11, %v659_v16  ;;  %vm573_vm10 = vmpackc.low %vm113_vm7, %vm110_vm4 }
  0x47   :  { %569 = vmatprep.subr.bf16.mxu1 %v656_v1 }
  0x49   :  { %546 = vmatpush1.bf16.msk.msra.mxu0 %vm545_vm15, %v659_v16 }
  0x4a   :  { %571 = vmatpush3.bf16.msk.msra.mxu1 %vm570_vm1, %v659_v16  ;;  %548 = vmatprep.subr.msk.bf16.mxu0 %vm547_vm2, %v659_v16 }
  0x4b   :  { %572 = vmatprep.subr.bf16.mxu1 %v656_v1 }
  0x4d   :  { %550 = vmatpush1.bf16.msk.msra.mxu0 %vm549_vm5, %v659_v16 }
  0x4e   :  { %574 = vmatpush3.bf16.msk.msra.mxu1 %vm573_vm10, %v659_v16 }
  0x50   :  { %276 = vmatmul.mubr.f32.vlgmr.msra.gmra.mrb[0].mxu0 %v210_v27 }
  0x51   :  { %517 = vmatmul.mubr.f32.vlgmr.msra.gmra.mrb[0].mxu1 %v210_v27 }
 0x123   :  { %v277_v28 = vpop.f32.mrb[0].mxu0 }
 0x124   :  { %352 = vst [vmem:[#allocation7] sm:$0xff] %v277_v28  ;;  %v348_v29 = vpop.f32.mrb[0].mxu1  ;;  %v279_v30 = vpop.f32.mrb[1].mxu0 }
 0x125   :  { %354 = vst [vmem:[#allocation7 + $0x10] sm:$0xff] %v348_v29  ;;  %353 = vst [vmem:[#allocation7 + $0x8] sm:$0xff] %v279_v30  ;;  %v518_v31 = vpop.f32.mrb[1].mxu1 }
 0x126   :  { %637 = shalt.err (!%p634_p6)
}
 0x127   :  { %s638_s9 = scalar_lea.hbm %s823_s2, 384 }
 0x128   :  { %p639_p7 = scmp.ne.s32.totalorder %s823_s2, %s638_s9  ;;  %p642_p8 = scmp.lt.u32.totalorder %s638_s9, %s823_s2 }
 0x12a   :  { %p644_p9 = pnand %p642_p8, %p639_p7 }
 0x12c   :  { %647 = shalt.err (!%p644_p9)
}
 0x12d   :  { %364 = dma.vmem_to_hbm [thread:$0]  %s362_s5, 384, %s823_s2, [#allocation4]  }
 0x12e   :  { %652 = dma.done.wait [#allocation4], 384  }
 0x12f   :  { %653 = vsyncadd [#allocation4], 4294966912 }
 0x130   :  { %368 = vsyncpa [#allocation3], 1 }
 0x131   :  { %369 = vsyncpa [#allocation6], 1 }
 0x132   :  { %370 = vsyncpa [#allocation4], 1 }

</bundles_post_ra>
